<compile_context>
chip_gen: v6e
topology: v6e:2x2x1
jax: 0.10.0
libtpu: 0.0.40
codegen_flags: <defaults>
</compile_context>

<pallas_src>
import math

import jax
import jax.numpy as jnp
from jax.experimental import pallas as pl
from jax.experimental.pallas import tpu as pltpu


K0 = 128  # per-position gather depth (>= combined vocab of 80; lane/MXU friendly)

_SIZES = {"month": 13, "day": 32, "weekday": 7, "hour": 24, "minute": 4}


def _features(freq: str):
    """(name, x-channel) pairs, exactly the columns the PyTorch forward reads."""
    feats = [("month", 0), ("day", 1), ("weekday", 2), ("hour", 3)]
    if freq == "t":
        feats.append(("minute", 4))
    return feats


def make_fixed_weight(c_in: int, d_model: int) -> jnp.ndarray:
    """Sinusoidal table identical to FixedEmbedding.__init__ (non-trainable)."""
    position = jnp.arange(c_in, dtype=jnp.float32)[:, None]
    div_term = jnp.exp(
        jnp.arange(0, d_model, 2, dtype=jnp.float32) * -(math.log(10000.0) / d_model)
    )
    w = jnp.zeros((c_in, d_model), dtype=jnp.float32)
    w = w.at[:, 0::2].set(jnp.sin(position * div_term))
    w = w.at[:, 1::2].set(jnp.cos(position * div_term[: d_model // 2]))
    return w


def _build_tables(d_model: int, freq: str, G: int):
    """Constant operands for the kernel.

    Returns (feats, sizes, offsets, W, S, kin) where
      W : (G*K0, G*d_model) block-diagonal sinusoidal table (group g -> out cols [g*d,(g+1)*d))
      S : (kin, G*K0) selector so that  (ids_aug @ S)[:, g*K0 + c] ==
            ids[g, feature_owning(c)] - c   if column c is owned by some feature,
            -c                              otherwise.
          Hence the multi-hot gather matrix is exactly ((ids_aug @ S) == 0).
      kin: contraction width (G*F + 1 rounded up to a sublane multiple of 8).
    """
    feats = _features(freq)
    F = len(feats)
    sizes = [_SIZES[n] for n, _ in feats]
    offsets, acc = [], 0
    for s in sizes:
        offsets.append(acc)
        acc += s
    assert acc <= K0 - 1, "combined vocab must leave headroom for the no-hit pad id (127)"

    # combined per-feature table stacked into one (K0, d_model) block; rows >= acc stay zero
    base = jnp.zeros((K0, d_model), jnp.float32)
    for off, s in zip(offsets, sizes):
        base = base.at[off:off + s, :].set(make_fixed_weight(s, d_model))

    d_out = G * d_model
    w = jnp.zeros((G * K0, d_out), jnp.float32)
    for g in range(G):
        w = w.at[g * K0:(g + 1) * K0, g * d_model:(g + 1) * d_model].set(base)

    kin = ((G * F + 1 + 7) // 8) * 8  # pad contraction width to a sublane multiple
    local = jnp.arange(K0, dtype=jnp.float32)
    s_mat = jnp.zeros((kin, G * K0), jnp.float32)
    for g in range(G):
        for fi, (off, sz) in enumerate(zip(offsets, sizes)):
            mask = ((local >= off) & (local < off + sz)).astype(jnp.float32)
            s_mat = s_mat.at[g * F + fi, g * K0:(g + 1) * K0].set(mask)
    # constant-ones column of ids_aug drives this "- column index" row (same for every group)
    s_mat = s_mat.at[G * F, :].set(-jnp.tile(local, (G,)))
    return feats, sizes, offsets, w, s_mat, kin


def temporal_embedding_kernel(ids_ref, s_ref, w_ref, out_ref):
    # ids_ref : (tn, kin) f32 -- G positions x F combined-table ids per row, one 1.0 column,
    #                            zero padding.  All exact small integers (<= 127).
    # s_ref   : (kin, G*K0) f32 constant selector (see _build_tables).
    # w_ref   : (G*K0, G*d_model) f32 block-diagonal sinusoidal table.
    # out_ref : (tn, G*d_model) f32 lane-dense summed embeddings (G positions per row).
    r = jnp.dot(ids_ref[...], s_ref[...], preferred_element_type=jnp.float32)
    hot = (r == 0.0).astype(jnp.float32)          # multi-hot gather matrix, built on the MXU
    out_ref[...] = jnp.dot(hot, w_ref[...], preferred_element_type=jnp.float32)


def temporal_embedding(x: jnp.ndarray, d_model: int, freq: str = "h",
                       tn: int = 1024) -> jnp.ndarray:
    """Pallas forward of TemporalEmbedding: (B, L, C>=4|5) int -> (B, L, d_model) f32."""
    assert x.ndim == 3
    B, L, C = x.shape

    # Lane-dense grouping: pack G consecutive (b, l) positions per kernel output row so the
    # stored last dim is a full multiple of 128 lanes (unmasked stores, contiguous writeback).
    if d_model <= 128 and 128 % d_model == 0:
        G = 128 // d_model
    else:
        G = 1  # TODO(synk): d_model not a divisor/multiple of 128 keeps a narrower output store
    d_out = G * d_model

    feats, sizes, offsets, w, s_mat, kin = _build_tables(d_model, freq, G)
    F = len(feats)
    assert C >= max(chan for _, chan in feats) + 1

    # Combined-table row ids per position/feature, clamped like jnp.take.  Values < K0 so they
    # are exact in f32 (and bf16), which keeps the in-kernel selector matmul exact.
    N = B * L
    xi = x.reshape(N, C).astype(jnp.int32)
    ids = jnp.stack(
        [jnp.clip(xi[:, chan], 0, s - 1) + off
         for (_, chan), off, s in zip(feats, offsets, sizes)],
        axis=1,
    ).astype(jnp.float32)                                   # (N, F)

    # Pad the position count so it fills whole (tn x G)-position tiles.  Pad id 127 lies
    # outside every feature's range -> padded rows produce exact zeros (and are sliced off).
    PAD = float(K0 - 1)
    m_need = pl.cdiv(N, G)
    tn_eff = min(tn, pl.cdiv(m_need, 8) * 8)    # clamp (to a sublane multiple) for tiny inputs
    m_pad = pl.cdiv(m_need, tn_eff) * tn_eff
    n_pad = m_pad * G
    if n_pad != N:
        ids = jnp.concatenate([ids, jnp.full((n_pad - N, F), PAD, jnp.float32)], axis=0)
    ids_g = ids.reshape(m_pad, G * F)
    pad_cols = kin - (G * F + 1)
    ids_aug = jnp.concatenate(
        [ids_g,
         jnp.ones((m_pad, 1), jnp.float32),                 # drives the "- column index" row
         jnp.zeros((m_pad, pad_cols), jnp.float32)], axis=1)  # (m_pad, kin)

    out = pl.pallas_call(
        temporal_embedding_kernel,
        out_shape=jax.ShapeDtypeStruct((m_pad, d_out), jnp.float32),
        grid_spec=pltpu.PrefetchScalarGridSpec(
            num_scalar_prefetch=0,
            grid=(m_pad // tn_eff,),
            in_specs=[
                # packed ids: one (tn, kin) f32 DMA per step (no degenerate per-feature tiles)
                pl.BlockSpec((tn_eff, kin), lambda i: (i, 0)),
                # tiny constant operands; constant block index -> stay VMEM-resident
                pl.BlockSpec((kin, G * K0), lambda i: (0, 0)),
                pl.BlockSpec((G * K0, d_out), lambda i: (0, 0)),
            ],
            # lane-dense output tile: last dim is G*d_model (= 128 for d_model = 32)
            out_specs=pl.BlockSpec((tn_eff, d_out), lambda i: (i, 0)),
        ),
        compiler_params=pltpu.CompilerParams(dimension_semantics=("parallel",)),
    )(ids_aug, s_mat, w)

    # Contiguous row-major un-grouping; padded tail rows are exact zeros and get sliced off.
    return out.reshape(m_pad * G, d_model)[:N].reshape(B, L, d_model)


def temporal_embedding_ref(x: jnp.ndarray, d_model: int, freq: str = "h") -> jnp.ndarray:
    """Plain-JAX reference == PyTorch TemporalEmbedding.forward with fixed embeddings."""
    feats = _features(freq)
    out = jnp.zeros((x.shape[0], x.shape[1], d_model), jnp.float32)
    for name, chan in feats:
        s = _SIZES[name]
        tbl = make_fixed_weight(s, d_model)
        idx = jnp.clip(x[..., chan].astype(jnp.int32), 0, s - 1)
        out = out + jnp.take(tbl, idx, axis=0)
    return out


if __name__ == "__main__":
    d_model = 32
    key = jax.random.PRNGKey(0)

    def random_marks(k, B, L):
        ks = jax.random.split(k, 5)
        month = jax.random.randint(ks[0], (B, L), 0, 13)
        day = jax.random.randint(ks[1], (B, L), 0, 32)
        weekday = jax.random.randint(ks[2], (B, L), 0, 7)
        hour = jax.random.randint(ks[3], (B, L), 0, 24)
        minute = jax.random.randint(ks[4], (B, L), 0, 4)
        return jnp.stack([month, day, weekday, hour, minute], axis=-1).astype(jnp.int32)

    # Small shapes consistent with the module: batch=2, seq=8, hidden=32, freq='h'.
    k1, k2 = jax.random.split(key)
    x = random_marks(k1, 2, 8)                                     # (2, 8, 5)
    out = jax.block_until_ready(temporal_embedding(x, d_model=d_model, freq="h"))
    ref = temporal_embedding_ref(x, d_model=d_model, freq="h")
    assert out.shape == (2, 8, d_model)
    assert jnp.allclose(out, ref, atol=1e-5), "mismatch vs reference (freq='h')"

    # Larger ragged run: exercises the padded tail, multi-position-per-row packing, and the
    # minute-embedding path (freq='t').
    x2 = random_marks(k2, 3, 700)                                  # (3, 700, 5) -> 2100 positions
    out2 = jax.block_until_ready(temporal_embedding(x2, d_model=d_model, freq="t"))
    ref2 = temporal_embedding_ref(x2, d_model=d_model, freq="t")
    assert out2.shape == (3, 700, d_model)
    assert jnp.allclose(out2, ref2, atol=1e-5), "mismatch vs reference (freq='t')"

    print("KERNEL_OK")
</pallas_src>

<mosaic_0001>
module attributes {stable_mosaic.version = 11 : i64} {
  func.func @temporal_embedding_kernel(%arg0: i32, %arg1: memref<8x24xf32, #tpu.memory_space<vmem>>, %arg2: memref<24x512xf32, #tpu.memory_space<vmem>>, %arg3: memref<512x128xf32, #tpu.memory_space<vmem>>, %arg4: memref<8x128xf32, #tpu.memory_space<vmem>>) attributes {dimension_semantics = [#tpu.dimension_semantics<parallel>], iteration_bounds = array<i64: 1>, scalar_prefetch = 0 : i64, scratch_operands = 0 : i64, tpu.core_type = #tpu.core_type<tc>, window_params = [{transform_indices = @transform_0, window_bounds = array<i64: 8, 24>}, {pipeline_mode = #tpu.pipeline_mode<synchronous>, transform_indices = @transform_1, window_bounds = array<i64: 24, 512>}, {pipeline_mode = #tpu.pipeline_mode<synchronous>, transform_indices = @transform_2, window_bounds = array<i64: 512, 128>}, {transform_indices = @transform_3, window_bounds = array<i64: 8, 128>}]} {
    %c0 = arith.constant 0 : index
    %c0_0 = arith.constant 0 : index
    %0 = vector.load %arg1[%c0, %c0_0] : memref<8x24xf32, #tpu.memory_space<vmem>>, vector<8x24xf32>
    %c0_1 = arith.constant 0 : index
    %c0_2 = arith.constant 0 : index
    %1 = vector.load %arg2[%c0_1, %c0_2] : memref<24x512xf32, #tpu.memory_space<vmem>>, vector<24x512xf32>
    %cst = arith.constant dense<0.000000e+00> : vector<8x512xf32>
    %2 = tpu.matmul %0, %1, %cst {dimension_numbers = #tpu.dot_dimension_numbers<[1], [0], [0], [1], [0, 0, 1, 1], [], []>} : vector<8x24xf32>, vector<24x512xf32>, vector<8x512xf32> -> vector<8x512xf32>
    %cst_3 = arith.constant 0.000000e+00 : f32
    %3 = vector.broadcast %cst_3 : f32 to vector<8x512xf32>
    %4 = arith.cmpf oeq, %2, %3 : vector<8x512xf32>
    %5 = arith.extui %4 : vector<8x512xi1> to vector<8x512xi32>
    %6 = arith.sitofp %5 : vector<8x512xi32> to vector<8x512xf32>
    %c0_4 = arith.constant 0 : index
    %c0_5 = arith.constant 0 : index
    %7 = vector.load %arg3[%c0_4, %c0_5] : memref<512x128xf32, #tpu.memory_space<vmem>>, vector<512x128xf32>
    %cst_6 = arith.constant dense<0.000000e+00> : vector<8x128xf32>
    %8 = tpu.matmul %6, %7, %cst_6 {dimension_numbers = #tpu.dot_dimension_numbers<[1], [0], [0], [1], [0, 0, 1, 1], [], []>} : vector<8x512xf32>, vector<512x128xf32>, vector<8x128xf32> -> vector<8x128xf32>
    %c0_7 = arith.constant 0 : index
    %c0_8 = arith.constant 0 : index
    %9 = vector.load %arg4[%c0_7, %c0_8] : memref<8x128xf32, #tpu.memory_space<vmem>>, vector<8x128xf32>
    tpu.vector_store %arg4[%c0_7, %c0_8], %8 {strides = array<i32>} : memref<8x128xf32, #tpu.memory_space<vmem>>, vector<8x128xf32>,
    return
  }
  func.func @transform_0(%arg0: i32) -> (i32, i32) {
    %c0_i32 = arith.constant 0 : i32
    %c0_i32_0 = arith.constant 0 : i32
    return %arg0, %c0_i32 : i32, i32
  }
  func.func @transform_1(%arg0: i32) -> (i32, i32) {
    %c0_i32 = arith.constant 0 : i32
    %c0_i32_0 = arith.constant 0 : i32
    %c0_i32_1 = arith.constant 0 : i32
    return %c0_i32, %c0_i32_0 : i32, i32
  }
  func.func @transform_2(%arg0: i32) -> (i32, i32) {
    %c0_i32 = arith.constant 0 : i32
    %c0_i32_0 = arith.constant 0 : i32
    %c0_i32_1 = arith.constant 0 : i32
    return %c0_i32, %c0_i32_0 : i32, i32
  }
  func.func @transform_3(%arg0: i32) -> (i32, i32) {
    %c0_i32 = arith.constant 0 : i32
    %c0_i32_0 = arith.constant 0 : i32
    return %arg0, %c0_i32 : i32, i32
  }
}

</mosaic_0001>

<bundles_post_ra>
// kernel: tpu_custom_call.1
= control target key start
LH: loop header
LB: loop body
LE: loop exit
PB: predicated region body
PF: predicated region fallthrough
CT: control target
= control target key end

     0   :  { %8 = vsyncpa [#allocation3], 0  ;;  %s664_s0 = inlined_call_operand.hbm [shape: f32[8,24], index: 0, kind: input, shape index: {}]   ;;  %s665_s1 = inlined_call_operand.hbm [shape: f32[24,512], index: 1, kind: input, shape index: {}]   ;;  %s666_s2 = inlined_call_operand.hbm [shape: f32[512,128], index: 2, kind: input, shape index: {}]   ;;  %s667_s3 = inlined_call_operand.hbm [shape: f32[8,128], index: 3, kind: output, shape index: {}]  }
   0x1   :  { %9 = vsyncpa [#allocation6], 0 }
   0x2   :  { %10 = vsyncpa [#allocation4], 0  ;;  %s622_s12 = smov [#allocation5]  }
   0x3   :  { %s26_s13 = sshll.u32 %s622_s12, 4  ;;  %s27_s13 = int_to_ptr.vmem [resolvable:$true] %s26_s13 }
   0x4   :  { %s544_s14 = scalar_lea.vmem %s27_s13, 1536  ;;  %p549_p1 = scmp.lt.s32.totalorder %s27_s13, %s27_s13 }
   0x5   :  { %p545_p0 = scmp.ne.s32.totalorder %s27_s13, %s544_s14  ;;  %p550_p2 = scmp.lt.s32.totalorder %s544_s14, %s544_s14 }
   0x7   :  { %p551_p3 = por %p550_p2, %p549_p1 }
   0x9   :  { %p552_p4 = pnand %p551_p3, %p545_p0 }
   0xb   :  { %555 = shalt.err (!%p552_p4)
}
   0xc   :  { %s623_s15 = smov 512   ;;  %s624_s16 = smov 32  }
   0xd   :  { %32 = dma.hbm_to_vmem [thread:$0]  %s665_s1, 1536, %s27_s13, [#allocation6], %s623_s15, %s623_s15, %s624_s16  }
   0xe   :  { %s625_s19 = smov [#allocation2]   ;;  %s626_s21 = smov [#allocation7]  }
   0xf   :  { %s17_s20 = sshll.u32 %s625_s19, 4  ;;  %s38_s22 = sshll.u32 %s626_s21, 4  ;;  %s18_s20 = int_to_ptr.vmem [resolvable:$true] %s17_s20  ;;  %s39_s22 = int_to_ptr.vmem [resolvable:$true] %s38_s22 }
  0x10   :  { %s564_s23 = scalar_lea.vmem %s18_s20, 128  ;;  %p569_p6 = scmp.lt.s32.totalorder %s18_s20, %s18_s20 }
  0x11   :  { %p565_p5 = scmp.ne.s32.totalorder %s18_s20, %s564_s23  ;;  %p570_p7 = scmp.lt.s32.totalorder %s564_s23, %s564_s23 }
  0x13   :  { %p571_p8 = por %p570_p7, %p569_p6 }
  0x15   :  { %p572_p9 = pnand %p571_p8, %p565_p5 }
  0x17   :  { %575 = shalt.err (!%p572_p9)
}
  0x18   :  { %20 = dma.hbm_to_vmem [thread:$0]  %s664_s0, 128, %s18_s20, [#allocation3]  }
  0x19   :  { %s584_s26 = scalar_lea.vmem %s39_s22, 8192  ;;  %p589_p11 = scmp.lt.s32.totalorder %s39_s22, %s39_s22 }
  0x1a   :  { %p585_p10 = scmp.ne.s32.totalorder %s39_s22, %s584_s26  ;;  %p590_p12 = scmp.lt.s32.totalorder %s584_s26, %s584_s26 }
  0x1c   :  { %p591_p13 = por %p590_p12, %p589_p11 }
  0x1e   :  { %p592_p0 = pnand %p591_p13, %p585_p10 }
  0x20   :  { %595 = shalt.err (!%p592_p0)
}
  0x21   :  { %s627_s1 = smov 128   ;;  %s628_s27 = smov 8  }
  0x22   :  { %44 = dma.hbm_to_vmem [thread:$0]  %s666_s2, 8192, %s39_s22, [#allocation6], %s627_s1, %s627_s1, %s628_s27  }
  0x23   :  { %616 = dma.done.wait [#allocation3], 128  }
  0x24   :  { %617 = vsyncadd [#allocation3], 4294967168 }
  0x25   :  { %618 = dma.done.wait [#allocation6], 9728  }
  0x26   :  { %619 = vsyncadd [#allocation6], 4294957568  ;;  %v629_v0 = vmov 0.0   ;;  %v64_v1 = vld [vmem:[#allocation5 + $0x48] sm:$0xff]  ;;  %v66_v2 = vld [vmem:[#allocation5 + $0x58] sm:$0xff]  ;;  %vm67_vm0 = vcmask 195584  }
  0x27   :  { %135 = vmatprep.mubr.f32.mxu0 %v629_v0  ;;  %206 = vmatprep.mubr.f32.mxu1 %v629_v0  ;;  %v63_v3 = vld [vmem:[#allocation5 + $0x40] sm:$0xff]  ;;  %v65_v4 = vld [vmem:[#allocation5 + $0x50] sm:$0xff]  ;;  %v60_v5 = vld [vmem:[#allocation5 + $0x28] sm:$0xff]  ;;  %s631_s0 = smov [#allocation8]  }
  0x28   :  { %97 = vmatprep.subr.mxu0 %v64_v1  ;;  %168 = vmatprep.subr.mxu1 %v66_v2  ;;  %v62_v6 = vld [vmem:[#allocation5 + $0x38] sm:$0xff]  ;;  %v59_v7 = vld [vmem:[#allocation5 + $0x20] sm:$0xff]  ;;  %v61_v8 = vld [vmem:[#allocation5 + $0x30] sm:$0xff]  ;;  %s436_s2 = sshll.u32 %s631_s0, 4  ;;  %s437_s2 = int_to_ptr.vmem [resolvable:$true] %s436_s2 }
  0x29   :  { %98 = vmatpush1.msra.mxu0 %v63_v3  ;;  %169 = vmatpush1.msra.mxu1 %v65_v4  ;;  %v56_v9 = vld [vmem:[#allocation5 + $0x8] sm:$0xff]  ;;  %v58_v10 = vld [vmem:[#allocation5 + $0x18] sm:$0xff]  ;;  %v55_v11 = vld [vmem:[#allocation5] sm:$0xff]  ;;  %s596_s30 = scalar_lea.vmem %s437_s2, 128  ;;  %p601_p2 = scmp.lt.s32.totalorder %s437_s2, %s437_s2 }
  0x2a   :  { %99 = vmatprep.subr.mxu0 %v60_v5  ;;  %170 = vmatprep.subr.mxu1 %v62_v6  ;;  %v57_v12 = vld [vmem:[#allocation5 + $0x10] sm:$0xff]  ;;  %v54_v13 = vld [vmem:[#allocation2] sm:$0xff]  ;;  %v254_v22 = vld [vmem:[#allocation7 + $0xe8] sm:$0xff]  ;;  %p597_p1 = scmp.ne.s32.totalorder %s437_s2, %s596_s30  ;;  %p602_p3 = scmp.lt.s32.totalorder %s596_s30, %s596_s30 }
  0x2b   :  { %100 = vmatpush1.msra.mxu0 %v59_v7  ;;  %171 = vmatpush1.msra.mxu1 %v61_v8  ;;  %v256_v14 = vld [vmem:[#allocation7 + $0xf8] sm:$0xff]  ;;  %v255_v18 = vld [vmem:[#allocation7 + $0xf0] sm:$0xff]  ;;  %v286_v23 = vld [vmem:[#allocation7 + $0x1e8] sm:$0xff] }
  0x2c   :  { %101 = vmatprep.subr.mxu0 %v56_v9  ;;  %172 = vmatprep.subr.mxu1 %v58_v10  ;;  %v288_v15 = vld [vmem:[#allocation7 + $0x1f8] sm:$0xff]  ;;  %v287_v19 = vld [vmem:[#allocation7 + $0x1f0] sm:$0xff]  ;;  %v238_v24 = vld [vmem:[#allocation7 + $0x68] sm:$0xff]  ;;  %p603_p4 = por %p602_p3, %p601_p2 }
  0x2d   :  { %102 = vmatpush1.msra.mxu0 %v55_v11  ;;  %173 = vmatpush1.msra.mxu1 %v57_v12  ;;  %v240_v16 = vld [vmem:[#allocation7 + $0x78] sm:$0xff]  ;;  %v239_v20 = vld [vmem:[#allocation7 + $0x70] sm:$0xff]  ;;  %v270_v25 = vld [vmem:[#allocation7 + $0x168] sm:$0xff] }
  0x2e   :  { %v272_v17 = vld [vmem:[#allocation7 + $0x178] sm:$0xff]  ;;  %446 = vmatmul.mubr.msk.f32.vlgmr.msra.gmra.mxu0 %vm67_vm0, %v54_v13  ;;  %447 = vmatmul.mubr.msk.f32.vlgmr.msra.gmra.mxu1 %vm67_vm0, %v54_v13  ;;  %v271_v21 = vld [vmem:[#allocation7 + $0x170] sm:$0xff]  ;;  %v253_v26 = vld [vmem:[#allocation7 + $0xe0] sm:$0xff]  ;;  %p604_p5 = pnand %p603_p4, %p597_p1 }
  0x2f   :  { %456 = vmatprep.subr.mxu0 %v256_v14  ;;  %491 = vmatprep.subr.mxu1 %v288_v15  ;;  %v285_v27 = vld [vmem:[#allocation7 + $0x1e0] sm:$0xff]  ;;  %v252_v30 = vld [vmem:[#allocation7 + $0xd8] sm:$0xff]  ;;  %v251_v34 = vld [vmem:[#allocation7 + $0xd0] sm:$0xff] }
  0x30   :  { %457 = vmatpush3.msra.mxu0 %v240_v16  ;;  %492 = vmatpush3.msra.mxu1 %v272_v17  ;;  %v237_v28 = vld [vmem:[#allocation7 + $0x60] sm:$0xff]  ;;  %v284_v31 = vld [vmem:[#allocation7 + $0x1d8] sm:$0xff]  ;;  %v283_v35 = vld [vmem:[#allocation7 + $0x1d0] sm:$0xff] }
  0x31   :  { %458 = vmatprep.subr.mxu0 %v255_v18  ;;  %493 = vmatprep.subr.mxu1 %v287_v19  ;;  %v269_v29 = vld [vmem:[#allocation7 + $0x160] sm:$0xff]  ;;  %v236_v32 = vld [vmem:[#allocation7 + $0x58] sm:$0xff]  ;;  %v235_v36 = vld [vmem:[#allocation7 + $0x50] sm:$0xff]  ;;  %v630_v18 = vmov 1.0  }
  0x32   :  { %459 = vmatpush3.msra.mxu0 %v239_v20  ;;  %494 = vmatpush3.msra.mxu1 %v271_v21  ;;  %v268_v33 = vld [vmem:[#allocation7 + $0x158] sm:$0xff]  ;;  %v267_v37 = vld [vmem:[#allocation7 + $0x150] sm:$0xff]  ;;  %v250_v38 = vld [vmem:[#allocation7 + $0xc8] sm:$0xff] }
  0x33   :  { %460 = vmatprep.subr.mxu0 %v254_v22  ;;  %495 = vmatprep.subr.mxu1 %v286_v23  ;;  %v282_v39 = vld [vmem:[#allocation7 + $0x1c8] sm:$0xff]  ;;  %v249_v42 = vld [vmem:[#allocation7 + $0xc0] sm:$0xff]  ;;  %v248_v46 = vld [vmem:[#allocation7 + $0xb8] sm:$0xff] }
  0x34   :  { %461 = vmatpush3.msra.mxu0 %v238_v24  ;;  %496 = vmatpush3.msra.mxu1 %v270_v25  ;;  %v234_v40 = vld [vmem:[#allocation7 + $0x48] sm:$0xff]  ;;  %v281_v43 = vld [vmem:[#allocation7 + $0x1c0] sm:$0xff]  ;;  %v280_v47 = vld [vmem:[#allocation7 + $0x1b8] sm:$0xff] }
  0x35   :  { %462 = vmatprep.subr.mxu0 %v253_v26  ;;  %497 = vmatprep.subr.mxu1 %v285_v27  ;;  %v266_v41 = vld [vmem:[#allocation7 + $0x148] sm:$0xff]  ;;  %v233_v44 = vld [vmem:[#allocation7 + $0x40] sm:$0xff]  ;;  %v232_v48 = vld [vmem:[#allocation7 + $0x38] sm:$0xff] }
  0x36   :  { %463 = vmatpush3.msra.mxu0 %v237_v28  ;;  %498 = vmatpush3.msra.mxu1 %v269_v29  ;;  %v265_v45 = vld [vmem:[#allocation7 + $0x140] sm:$0xff]  ;;  %v264_v49 = vld [vmem:[#allocation7 + $0x138] sm:$0xff]  ;;  %v247_v50 = vld [vmem:[#allocation7 + $0xb0] sm:$0xff] }
  0x37   :  { %464 = vmatprep.subr.mxu0 %v252_v30  ;;  %499 = vmatprep.subr.mxu1 %v284_v31  ;;  %v279_v51 = vld [vmem:[#allocation7 + $0x1b0] sm:$0xff]  ;;  %v246_v54 = vld [vmem:[#allocation7 + $0xa8] sm:$0xff]  ;;  %v245_v58 = vld [vmem:[#allocation7 + $0xa0] sm:$0xff] }
  0x38   :  { %465 = vmatpush3.msra.mxu0 %v236_v32  ;;  %500 = vmatpush3.msra.mxu1 %v268_v33  ;;  %v231_v52 = vld [vmem:[#allocation7 + $0x30] sm:$0xff]  ;;  %v278_v55 = vld [vmem:[#allocation7 + $0x1a8] sm:$0xff]  ;;  %v277_v59 = vld [vmem:[#allocation7 + $0x1a0] sm:$0xff] }
  0x39   :  { %466 = vmatprep.subr.mxu0 %v251_v34  ;;  %501 = vmatprep.subr.mxu1 %v283_v35  ;;  %v263_v53 = vld [vmem:[#allocation7 + $0x130] sm:$0xff]  ;;  %v230_v56 = vld [vmem:[#allocation7 + $0x28] sm:$0xff]  ;;  %v229_v60 = vld [vmem:[#allocation7 + $0x20] sm:$0xff] }
  0x3a   :  { %467 = vmatpush3.msra.mxu0 %v235_v36  ;;  %502 = vmatpush3.msra.mxu1 %v267_v37  ;;  %v262_v57 = vld [vmem:[#allocation7 + $0x128] sm:$0xff]  ;;  %v261_v61 = vld [vmem:[#allocation7 + $0x120] sm:$0xff]  ;;  %v244_v62 = vld [vmem:[#allocation7 + $0x98] sm:$0xff] }
  0x3b   :  { %468 = vmatprep.subr.mxu0 %v250_v38  ;;  %503 = vmatprep.subr.mxu1 %v282_v39  ;;  %v276_v63 = vld [vmem:[#allocation7 + $0x198] sm:$0xff]  ;;  %v243_v2 = vld [vmem:[#allocation7 + $0x90] sm:$0xff]  ;;  %v242_v6 = vld [vmem:[#allocation7 + $0x88] sm:$0xff] }
  0x3c   :  { %469 = vmatpush3.msra.mxu0 %v234_v40  ;;  %504 = vmatpush3.msra.mxu1 %v266_v41  ;;  %v228_v0 = vld [vmem:[#allocation7 + $0x18] sm:$0xff]  ;;  %v275_v3 = vld [vmem:[#allocation7 + $0x190] sm:$0xff]  ;;  %v274_v7 = vld [vmem:[#allocation7 + $0x188] sm:$0xff] }
  0x3d   :  { %470 = vmatprep.subr.mxu0 %v249_v42  ;;  %505 = vmatprep.subr.mxu1 %v281_v43  ;;  %v260_v1 = vld [vmem:[#allocation7 + $0x118] sm:$0xff]  ;;  %v227_v4 = vld [vmem:[#allocation7 + $0x10] sm:$0xff]  ;;  %v226_v8 = vld [vmem:[#allocation7 + $0x8] sm:$0xff] }
  0x3e   :  { %471 = vmatpush3.msra.mxu0 %v233_v44  ;;  %506 = vmatpush3.msra.mxu1 %v265_v45  ;;  %v259_v5 = vld [vmem:[#allocation7 + $0x110] sm:$0xff]  ;;  %v258_v9 = vld [vmem:[#allocation7 + $0x108] sm:$0xff]  ;;  %v241_v10 = vld [vmem:[#allocation7 + $0x80] sm:$0xff] }
  0x3f   :  { %472 = vmatprep.subr.mxu0 %v248_v46  ;;  %507 = vmatprep.subr.mxu1 %v280_v47  ;;  %v273_v11 = vld [vmem:[#allocation7 + $0x180] sm:$0xff] }
  0x40   :  { %473 = vmatpush3.msra.mxu0 %v232_v48  ;;  %508 = vmatpush3.msra.mxu1 %v264_v49  ;;  %v225_v12 = vld [vmem:[#allocation7] sm:$0xff] }
  0x41   :  { %474 = vmatprep.subr.mxu0 %v247_v50  ;;  %509 = vmatprep.subr.mxu1 %v279_v51  ;;  %v257_v13 = vld [vmem:[#allocation7 + $0x100] sm:$0xff] }
  0x42   :  { %475 = vmatpush3.msra.mxu0 %v231_v52  ;;  %510 = vmatpush3.msra.mxu1 %v263_v53 }
  0x43   :  { %476 = vmatprep.subr.mxu0 %v246_v54  ;;  %511 = vmatprep.subr.mxu1 %v278_v55 }
  0x44   :  { %477 = vmatpush3.msra.mxu0 %v230_v56  ;;  %512 = vmatpush3.msra.mxu1 %v262_v57 }
  0x45   :  { %478 = vmatprep.subr.mxu0 %v245_v58  ;;  %513 = vmatprep.subr.mxu1 %v277_v59 }
  0x46   :  { %479 = vmatpush3.msra.mxu0 %v229_v60  ;;  %514 = vmatpush3.msra.mxu1 %v261_v61 }
  0x47   :  { %480 = vmatprep.subr.mxu0 %v244_v62  ;;  %515 = vmatprep.subr.mxu1 %v276_v63 }
  0x48   :  { %481 = vmatpush3.msra.mxu0 %v228_v0  ;;  %516 = vmatpush3.msra.mxu1 %v260_v1 }
  0x49   :  { %482 = vmatprep.subr.mxu0 %v243_v2  ;;  %517 = vmatprep.subr.mxu1 %v275_v3 }
  0x4a   :  { %483 = vmatpush3.msra.mxu0 %v227_v4  ;;  %518 = vmatpush3.msra.mxu1 %v259_v5 }
  0x4b   :  { %484 = vmatprep.subr.mxu0 %v242_v6  ;;  %519 = vmatprep.subr.mxu1 %v274_v7 }
  0x4c   :  { %485 = vmatpush3.msra.mxu0 %v226_v8  ;;  %520 = vmatpush3.msra.mxu1 %v258_v9 }
  0x4d   :  { %486 = vmatprep.subr.mxu0 %v241_v10  ;;  %521 = vmatprep.subr.mxu1 %v273_v11 }
  0x4e   :  { %487 = vmatpush3.msra.mxu0 %v225_v12  ;;  %522 = vmatpush3.msra.mxu1 %v257_v13 }
  0xee   :  { %v137_v14 = vpop.f32.mrf.mxu0  ;;  %v208_v15 = vpop.f32.mrf.mxu1 }
  0xef   :  { %vm213_vm3 = vcmp.eq.f32.partialorder %v137_v14, 0.0  ;;  %vm215_vm4 = vcmp.eq.f32.partialorder %v208_v15, 0.0 }
  0xf0   :  { %v139_v16 = vpop.f32.mrf.mxu0  ;;  %v210_v17 = vpop.f32.mrf.mxu1 }
  0xf1   :  { %vm214_vm1 = vcmp.eq.f32.partialorder %v139_v16, 0.0  ;;  %vm216_vm2 = vcmp.eq.f32.partialorder %v210_v17, 0.0 }
  0xf2   :  { %452 = vmatprep.mubr.msk.f32.mxu0 %vm214_vm1, %v630_v18  ;;  %454 = vmatprep.mubr.msk.f32.mxu1 %vm216_vm2, %v630_v18 }
  0xf3   :  { %453 = vmatmul.mubr.msk.f32.vlgmr.msra.gmra.mxu0 %vm213_vm3, %v630_v18  ;;  %455 = vmatmul.mubr.msk.f32.vlgmr.msra.gmra.mxu1 %vm215_vm4, %v630_v18 }
 0x1b3   :  { %v488_v19 = vpop.f32.mrf.mxu0  ;;  %v523_v20 = vpop.f32.mrf.mxu1 }
 0x1b5   :  { %v489_v21 = vpop.f32.mrf.mxu0  ;;  %v524_v22 = vpop.f32.mrf.mxu1 }
 0x1b6   :  { %v490_v23 = vadd.f32 %v489_v21, %v488_v19  ;;  %v525_v24 = vadd.f32 %v524_v22, %v523_v20 }
 0x1b8   :  { %v426_v25 = vadd.f32 %v525_v24, %v490_v23 }
 0x1ba   :  { %429 = vst [vmem:[#allocation8] sm:$0xff] %v426_v25 }
 0x1bb   :  { %607 = shalt.err (!%p604_p5)
}
 0x1bc   :  { %439 = dma.vmem_to_hbm [thread:$0]  %s437_s2, 128, %s667_s3, [#allocation4]  }
 0x1bd   :  { %620 = dma.done.wait [#allocation4], 128  }
 0x1be   :  { %621 = vsyncadd [#allocation4], 4294967168 }
 0x1bf   :  { %443 = vsyncpa [#allocation3], 1 }
 0x1c0   :  { %444 = vsyncpa [#allocation6], 1 }
 0x1c1   :  { %445 = vsyncpa [#allocation4], 1 }

</bundles_post_ra>
